<compile_context>
chip_gen: v7x
topology: tpu7x:2x2x1
jax: 0.10.0
libtpu: 0.0.40
codegen_flags: <defaults>
</compile_context>

<pallas_src>
import functools

import jax
import jax.numpy as jnp
from jax import lax
from jax.experimental import pallas as pl
from jax.experimental.pallas import tpu as pltpu


def _mha_kernel(xq_ref, xkv_ref, wq_ref, wkv_ref, wo_ref,
                bq_ref, bkv_ref, bo_ref, o_ref, k_ref, v_ref,
                *, num_heads, d_k, compute_dtype):
    d_model = num_heads * d_k
    qi = pl.program_id(1)

    # K/V projection for the full sequence: once per batch element, kept
    # resident in VMEM scratch for all query tiles of this batch element.
    @pl.when(qi == 0)
    def _():
        xkv = xkv_ref[0].astype(compute_dtype)                       # (S, D)
        kv = jnp.dot(xkv, wkv_ref[...],
                     preferred_element_type=jnp.float32) + bkv_ref[...]
        k_ref[...] = kv[:, :d_model].astype(compute_dtype)
        v_ref[...] = kv[:, d_model:].astype(compute_dtype)

    # Q projection for this query tile; fold 1/sqrt(d_k) into q once.
    xq = xq_ref[0].astype(compute_dtype)                             # (TQ, D)
    q = jnp.dot(xq, wq_ref[...],
                preferred_element_type=jnp.float32) + bq_ref[...]
    q = (q * (1.0 / float(d_k) ** 0.5)).astype(compute_dtype)

    k = k_ref[...]                                                   # (S, D)
    v = v_ref[...]
    wo = wo_ref[...]                                                 # (D, D) [in, out]

    tq = q.shape[0]
    acc = jnp.zeros((tq, d_model), jnp.float32)

    # Contract the d_k axis of q and k directly -> no in-kernel transposes.
    contract_last = (((1,), (1,)), ((), ()))
    for h in range(num_heads):                     # static unroll (few heads)
        lo = h * d_k
        qh = q[:, lo:lo + d_k]                     # (TQ, d_k)
        kh = k[:, lo:lo + d_k]                     # (S,  d_k)
        vh = v[:, lo:lo + d_k]                     # (S,  d_k)

        s = lax.dot_general(qh, kh, contract_last,
                            preferred_element_type=jnp.float32)      # (TQ, S)
        m = jnp.max(s, axis=-1, keepdims=True)
        p = jnp.exp(s - m)
        l = jnp.sum(p, axis=-1, keepdims=True)
        ctx = jnp.dot(p.astype(compute_dtype), vh,
                      preferred_element_type=jnp.float32)            # (TQ, d_k)
        # Softmax normalization via EUP approximate reciprocal (no divide).
        ctx = ctx * pl.reciprocal(l, approx=True)

        # Accumulate this head's output-projection contribution instead of
        # concatenating heads along the lane axis.
        acc = acc + jnp.dot(ctx.astype(compute_dtype), wo[lo:lo + d_k, :],
                            preferred_element_type=jnp.float32)

    o_ref[0] = (acc + bo_ref[...]).astype(o_ref.dtype)


def multi_head_attention(x, params, num_heads, *, compute_dtype=jnp.float32):
    """x: [B, S, D]. params: PyTorch-convention weights/biases (W: [out, in])."""
    B, S, D = x.shape
    assert D % num_heads == 0, "d_model must be divisible by num_heads"
    d_k = D // num_heads

    # Query tile: 128 when it divides S (pipeline depth + bounded (TQ,S) scores),
    # else the whole sequence.
    TQ = 128 if S % 128 == 0 else S
    n_q = S // TQ

    # One-time weight re-pack: transpose to [in, out], fuse K/V, cast matmul
    # operands to compute_dtype (biases stay f32, added post-accumulation).
    wq_t = params["wq"].T.astype(compute_dtype)                         # (D, D)
    wkv_t = jnp.concatenate([params["wk"], params["wv"]], axis=0).T     # (D, 2D)
    wkv_t = wkv_t.astype(compute_dtype)
    wo_t = params["wo"].T.astype(compute_dtype)                         # (D, D)
    bq = params["bq"].reshape(1, D).astype(jnp.float32)
    bkv = jnp.concatenate([params["bk"], params["bv"]]).reshape(1, 2 * D)
    bkv = bkv.astype(jnp.float32)
    bo = params["bo"].reshape(1, D).astype(jnp.float32)

    kernel = functools.partial(_mha_kernel, num_heads=num_heads, d_k=d_k,
                               compute_dtype=compute_dtype)

    # Explicit scoped-VMEM request with headroom, kept below v7x's 64 MiB.
    c_bytes = jnp.dtype(compute_dtype).itemsize
    x_bytes = x.dtype.itemsize
    vmem_est = (
        2 * (4 * D * D) * c_bytes            # double-buffered WqT / WkvT / WoT
        + 2 * (TQ + S) * D * x_bytes         # query-tile x + full-x block
        + 2 * TQ * D * x_bytes               # output tile
        + 2 * S * D * c_bytes                # resident K/V scratch
        + (TQ * S + 4 * TQ * D) * 4          # transient scores / q / acc
    )
    vmem_limit = int(min(60 * 2**20, max(32 * 2**20, 2 * vmem_est)))

    const_spec = lambda shape: pl.BlockSpec(shape, lambda b, i: (0, 0))

    return pl.pallas_call(
        kernel,
        out_shape=jax.ShapeDtypeStruct((B, S, D), x.dtype),
        grid_spec=pltpu.PrefetchScalarGridSpec(
            num_scalar_prefetch=0,
            grid=(B, n_q),
            in_specs=[
                pl.BlockSpec((1, TQ, D), lambda b, i: (b, i, 0)),   # x (query tile)
                pl.BlockSpec((1, S, D), lambda b, i: (b, 0, 0)),    # x (full, for K/V)
                const_spec((D, D)),          # WqT
                const_spec((D, 2 * D)),      # [WkT | WvT]
                const_spec((D, D)),          # WoT
                const_spec((1, D)),          # bq
                const_spec((1, 2 * D)),      # [bk | bv]
                const_spec((1, D)),          # bo
            ],
            out_specs=pl.BlockSpec((1, TQ, D), lambda b, i: (b, i, 0)),
            scratch_shapes=[
                pltpu.VMEM((S, D), compute_dtype),   # K, resident per batch elem
                pltpu.VMEM((S, D), compute_dtype),   # V, resident per batch elem
            ],
        ),
        compiler_params=pltpu.CompilerParams(
            dimension_semantics=("parallel", "arbitrary"),
            vmem_limit_bytes=vmem_limit),
    )(x, x, wq_t, wkv_t, wo_t, bq, bkv, bo)


def _init_params(key, d_model):
    ks = jax.random.split(key, 8)
    scale = 1.0 / jnp.sqrt(jnp.float32(d_model))
    def w(k):
        return jax.random.uniform(k, (d_model, d_model), jnp.float32,
                                  minval=-1.0, maxval=1.0) * scale
    def b(k):
        return jax.random.uniform(k, (d_model,), jnp.float32,
                                  minval=-1.0, maxval=1.0) * scale
    return {"wq": w(ks[0]), "bq": b(ks[1]), "wk": w(ks[2]), "bk": b(ks[3]),
            "wv": w(ks[4]), "bv": b(ks[5]), "wo": w(ks[6]), "bo": b(ks[7])}


def _reference(x, p, num_heads):
    """Pure-JAX reference matching the PyTorch module exactly."""
    B, S, D = x.shape
    d_k = D // num_heads
    def lin(t, w, b):
        return jnp.einsum("bsd,od->bso", t, w) + b
    q = lin(x, p["wq"], p["bq"]).reshape(B, S, num_heads, d_k).transpose(0, 2, 1, 3)
    k = lin(x, p["wk"], p["bk"]).reshape(B, S, num_heads, d_k).transpose(0, 2, 1, 3)
    v = lin(x, p["wv"], p["bv"]).reshape(B, S, num_heads, d_k).transpose(0, 2, 1, 3)
    scores = jnp.einsum("bhqd,bhkd->bhqk", q, k) / jnp.sqrt(jnp.float32(d_k))
    attn = jax.nn.softmax(scores, axis=-1)
    ctx = jnp.einsum("bhqk,bhkd->bhqd", attn, v)
    ctx = ctx.transpose(0, 2, 1, 3).reshape(B, S, D)
    return lin(ctx, p["wo"], p["bo"])


if __name__ == "__main__":
    B, S, D, H = 2, 8, 32, 4

    key = jax.random.PRNGKey(0)
    kx, kp = jax.random.split(key)
    x = jax.random.normal(kx, (B, S, D), jnp.float32)
    params = _init_params(kp, D)

    ref = _reference(x, params, H)

    # f32 compute path (approx-reciprocal softmax normalization).
    out = jax.block_until_ready(multi_head_attention(x, params, num_heads=H))
    assert out.shape == (B, S, D)
    assert jnp.allclose(out, ref, atol=3e-2, rtol=3e-2), "f32 mismatch vs reference"

    # bf16 MXU-input path (f32 accumulation / softmax), looser tolerance.
    out_bf16 = jax.block_until_ready(
        multi_head_attention(x, params, num_heads=H, compute_dtype=jnp.bfloat16))
    assert out_bf16.dtype == x.dtype
    assert jnp.allclose(out_bf16, ref, atol=1.5e-1, rtol=1.5e-1), "bf16 mismatch vs reference"

    print("KERNEL_OK")
</pallas_src>

<mosaic_0001>
module attributes {stable_mosaic.version = 11 : i64} {
  func.func @_mha_kernel(%arg0: i32, %arg1: i32, %arg2: memref<1x8x32xf32, #tpu.memory_space<vmem>>, %arg3: memref<1x8x32xf32, #tpu.memory_space<vmem>>, %arg4: memref<32x32xf32, #tpu.memory_space<vmem>>, %arg5: memref<32x64xf32, #tpu.memory_space<vmem>>, %arg6: memref<32x32xf32, #tpu.memory_space<vmem>>, %arg7: memref<1x32xf32, #tpu.memory_space<vmem>>, %arg8: memref<1x64xf32, #tpu.memory_space<vmem>>, %arg9: memref<1x32xf32, #tpu.memory_space<vmem>>, %arg10: memref<1x8x32xf32, #tpu.memory_space<vmem>>, %arg11: memref<8x32xf32, #tpu.memory_space<vmem>>, %arg12: memref<8x32xf32, #tpu.memory_space<vmem>>) attributes {dimension_semantics = [#tpu.dimension_semantics<parallel>, #tpu.dimension_semantics<arbitrary>], iteration_bounds = array<i64: 2, 1>, scalar_prefetch = 0 : i64, scratch_operands = 2 : i64, tpu.core_type = #tpu.core_type<tc>, window_params = [{transform_indices = @transform_0, window_bounds = array<i64: 1, 8, 32>}, {transform_indices = @transform_1, window_bounds = array<i64: 1, 8, 32>}, {pipeline_mode = #tpu.pipeline_mode<synchronous>, transform_indices = @transform_2, window_bounds = array<i64: 32, 32>}, {pipeline_mode = #tpu.pipeline_mode<synchronous>, transform_indices = @transform_3, window_bounds = array<i64: 32, 64>}, {pipeline_mode = #tpu.pipeline_mode<synchronous>, transform_indices = @transform_4, window_bounds = array<i64: 32, 32>}, {pipeline_mode = #tpu.pipeline_mode<synchronous>, transform_indices = @transform_5, window_bounds = array<i64: 1, 32>}, {pipeline_mode = #tpu.pipeline_mode<synchronous>, transform_indices = @transform_6, window_bounds = array<i64: 1, 64>}, {pipeline_mode = #tpu.pipeline_mode<synchronous>, transform_indices = @transform_7, window_bounds = array<i64: 1, 32>}, {transform_indices = @transform_8, window_bounds = array<i64: 1, 8, 32>}]} {
    %c0_i32 = arith.constant 0 : i32
    %0 = arith.cmpi eq, %arg1, %c0_i32 : i32
    %1 = arith.extui %0 : i1 to i32
    %c0_i32_0 = arith.constant 0 : i32
    %2 = arith.cmpi ne, %1, %c0_i32_0 : i32
    scf.if %2 {
      %c0_40 = arith.constant 0 : index
      %c0_41 = arith.constant 0 : index
      %c0_42 = arith.constant 0 : index
      %94 = vector.load %arg3[%c0_40, %c0_41, %c0_42] : memref<1x8x32xf32, #tpu.memory_space<vmem>>, vector<1x8x32xf32>
      %95 = vector.shape_cast %94 : vector<1x8x32xf32> to vector<8x32xf32>
      %c0_43 = arith.constant 0 : index
      %c0_44 = arith.constant 0 : index
      %96 = vector.load %arg5[%c0_43, %c0_44] : memref<32x64xf32, #tpu.memory_space<vmem>>, vector<32x64xf32>
      %cst_45 = arith.constant dense<0.000000e+00> : vector<8x64xf32>
      %97 = tpu.matmul %95, %96, %cst_45 {dimension_numbers = #tpu.dot_dimension_numbers<[1], [0], [0], [1], [0, 0, 1, 1], [], []>} : vector<8x32xf32>, vector<32x64xf32>, vector<8x64xf32> -> vector<8x64xf32>
      %c0_46 = arith.constant 0 : index
      %c0_47 = arith.constant 0 : index
      %98 = vector.load %arg8[%c0_46, %c0_47] : memref<1x64xf32, #tpu.memory_space<vmem>>, vector<1x64xf32>
      %99 = vector.broadcast %98 : vector<1x64xf32> to vector<8x64xf32>
      %100 = arith.addf %97, %99 : vector<8x64xf32>
      %101 = vector.extract_strided_slice %100 {offsets = [0, 0], sizes = [8, 32], strides = [1, 1]} : vector<8x64xf32> to vector<8x32xf32>
      %c0_48 = arith.constant 0 : index
      %c0_49 = arith.constant 0 : index
      %102 = vector.load %arg11[%c0_48, %c0_49] : memref<8x32xf32, #tpu.memory_space<vmem>>, vector<8x32xf32>
      tpu.vector_store %arg11[%c0_48, %c0_49], %101 {strides = array<i32>} : memref<8x32xf32, #tpu.memory_space<vmem>>, vector<8x32xf32>,
      %103 = vector.extract_strided_slice %100 {offsets = [0, 32], sizes = [8, 32], strides = [1, 1]} : vector<8x64xf32> to vector<8x32xf32>
      %c0_50 = arith.constant 0 : index
      %c0_51 = arith.constant 0 : index
      %104 = vector.load %arg12[%c0_50, %c0_51] : memref<8x32xf32, #tpu.memory_space<vmem>>, vector<8x32xf32>
      tpu.vector_store %arg12[%c0_50, %c0_51], %103 {strides = array<i32>} : memref<8x32xf32, #tpu.memory_space<vmem>>, vector<8x32xf32>,
    } else {
    }
    %c0 = arith.constant 0 : index
    %c0_1 = arith.constant 0 : index
    %c0_2 = arith.constant 0 : index
    %3 = vector.load %arg2[%c0, %c0_1, %c0_2] : memref<1x8x32xf32, #tpu.memory_space<vmem>>, vector<1x8x32xf32>
    %4 = vector.shape_cast %3 : vector<1x8x32xf32> to vector<8x32xf32>
    %c0_3 = arith.constant 0 : index
    %c0_4 = arith.constant 0 : index
    %5 = vector.load %arg4[%c0_3, %c0_4] : memref<32x32xf32, #tpu.memory_space<vmem>>, vector<32x32xf32>
    %cst = arith.constant dense<0.000000e+00> : vector<8x32xf32>
    %6 = tpu.matmul %4, %5, %cst {dimension_numbers = #tpu.dot_dimension_numbers<[1], [0], [0], [1], [0, 0, 1, 1], [], []>} : vector<8x32xf32>, vector<32x32xf32>, vector<8x32xf32> -> vector<8x32xf32>
    %c0_5 = arith.constant 0 : index
    %c0_6 = arith.constant 0 : index
    %7 = vector.load %arg7[%c0_5, %c0_6] : memref<1x32xf32, #tpu.memory_space<vmem>>, vector<1x32xf32>
    %8 = vector.broadcast %7 : vector<1x32xf32> to vector<8x32xf32>
    %9 = arith.addf %6, %8 : vector<8x32xf32>
    %cst_7 = arith.constant 0.353553385 : f32
    %10 = vector.broadcast %cst_7 : f32 to vector<8x32xf32>
    %11 = arith.mulf %9, %10 : vector<8x32xf32>
    %c0_8 = arith.constant 0 : index
    %c0_9 = arith.constant 0 : index
    %12 = vector.load %arg11[%c0_8, %c0_9] : memref<8x32xf32, #tpu.memory_space<vmem>>, vector<8x32xf32>
    %c0_10 = arith.constant 0 : index
    %c0_11 = arith.constant 0 : index
    %13 = vector.load %arg12[%c0_10, %c0_11] : memref<8x32xf32, #tpu.memory_space<vmem>>, vector<8x32xf32>
    %c0_12 = arith.constant 0 : index
    %c0_13 = arith.constant 0 : index
    %14 = vector.load %arg6[%c0_12, %c0_13] : memref<32x32xf32, #tpu.memory_space<vmem>>, vector<32x32xf32>
    %cst_14 = arith.constant 0.000000e+00 : f32
    %15 = vector.broadcast %cst_14 : f32 to vector<8x32xf32>
    %16 = vector.extract_strided_slice %11 {offsets = [0, 0], sizes = [8, 8], strides = [1, 1]} : vector<8x32xf32> to vector<8x8xf32>
    %17 = vector.extract_strided_slice %12 {offsets = [0, 0], sizes = [8, 8], strides = [1, 1]} : vector<8x32xf32> to vector<8x8xf32>
    %18 = vector.extract_strided_slice %13 {offsets = [0, 0], sizes = [8, 8], strides = [1, 1]} : vector<8x32xf32> to vector<8x8xf32>
    %cst_15 = arith.constant dense<0.000000e+00> : vector<8x8xf32>
    %19 = tpu.matmul %16, %17, %cst_15 {dimension_numbers = #tpu.dot_dimension_numbers<[1], [1], [0], [0], [0, 0, 1, 0], [], []>} : vector<8x8xf32>, vector<8x8xf32>, vector<8x8xf32> -> vector<8x8xf32>
    %cst_16 = arith.constant dense<0xFF800000> : vector<8xf32>
    %20 = vector.multi_reduction <maximumf>, %19, %cst_16 [1] : vector<8x8xf32> to vector<8xf32>
    %21 = vector.shape_cast %20 : vector<8xf32> to vector<8x1xf32>
    %22 = vector.broadcast %21 : vector<8x1xf32> to vector<8x8xf32>
    %23 = arith.subf %19, %22 : vector<8x8xf32>
    %24 = math.exp %23 : vector<8x8xf32>
    %cst_17 = arith.constant dense<0.000000e+00> : vector<8xf32>
    %25 = vector.multi_reduction <add>, %24, %cst_17 [1] : vector<8x8xf32> to vector<8xf32>
    %26 = vector.shape_cast %25 : vector<8xf32> to vector<8x1xf32>
    %cst_18 = arith.constant dense<0.000000e+00> : vector<8x8xf32>
    %27 = tpu.matmul %24, %18, %cst_18 {dimension_numbers = #tpu.dot_dimension_numbers<[1], [0], [0], [1], [0, 0, 1, 1], [], []>} : vector<8x8xf32>, vector<8x8xf32>, vector<8x8xf32> -> vector<8x8xf32>
    %28 = tpu.reciprocal %26 {approx = true} : vector<8x1xf32> -> vector<8x1xf32>
    %29 = vector.broadcast %28 : vector<8x1xf32> to vector<8x8xf32>
    %30 = arith.mulf %27, %29 : vector<8x8xf32>
    %31 = vector.extract_strided_slice %14 {offsets = [0, 0], sizes = [8, 32], strides = [1, 1]} : vector<32x32xf32> to vector<8x32xf32>
    %cst_19 = arith.constant dense<0.000000e+00> : vector<8x32xf32>
    %32 = tpu.matmul %30, %31, %cst_19 {dimension_numbers = #tpu.dot_dimension_numbers<[1], [0], [0], [1], [0, 0, 1, 1], [], []>} : vector<8x8xf32>, vector<8x32xf32>, vector<8x32xf32> -> vector<8x32xf32>
    %33 = arith.addf %15, %32 : vector<8x32xf32>
    %34 = vector.extract_strided_slice %11 {offsets = [0, 8], sizes = [8, 8], strides = [1, 1]} : vector<8x32xf32> to vector<8x8xf32>
    %35 = vector.extract_strided_slice %12 {offsets = [0, 8], sizes = [8, 8], strides = [1, 1]} : vector<8x32xf32> to vector<8x8xf32>
    %36 = vector.extract_strided_slice %13 {offsets = [0, 8], sizes = [8, 8], strides = [1, 1]} : vector<8x32xf32> to vector<8x8xf32>
    %cst_20 = arith.constant dense<0.000000e+00> : vector<8x8xf32>
    %37 = tpu.matmul %34, %35, %cst_20 {dimension_numbers = #tpu.dot_dimension_numbers<[1], [1], [0], [0], [0, 0, 1, 0], [], []>} : vector<8x8xf32>, vector<8x8xf32>, vector<8x8xf32> -> vector<8x8xf32>
    %cst_21 = arith.constant dense<0xFF800000> : vector<8xf32>
    %38 = vector.multi_reduction <maximumf>, %37, %cst_21 [1] : vector<8x8xf32> to vector<8xf32>
    %39 = vector.shape_cast %38 : vector<8xf32> to vector<8x1xf32>
    %40 = vector.broadcast %39 : vector<8x1xf32> to vector<8x8xf32>
    %41 = arith.subf %37, %40 : vector<8x8xf32>
    %42 = math.exp %41 : vector<8x8xf32>
    %cst_22 = arith.constant dense<0.000000e+00> : vector<8xf32>
    %43 = vector.multi_reduction <add>, %42, %cst_22 [1] : vector<8x8xf32> to vector<8xf32>
    %44 = vector.shape_cast %43 : vector<8xf32> to vector<8x1xf32>
    %cst_23 = arith.constant dense<0.000000e+00> : vector<8x8xf32>
    %45 = tpu.matmul %42, %36, %cst_23 {dimension_numbers = #tpu.dot_dimension_numbers<[1], [0], [0], [1], [0, 0, 1, 1], [], []>} : vector<8x8xf32>, vector<8x8xf32>, vector<8x8xf32> -> vector<8x8xf32>
    %46 = tpu.reciprocal %44 {approx = true} : vector<8x1xf32> -> vector<8x1xf32>
    %47 = vector.broadcast %46 : vector<8x1xf32> to vector<8x8xf32>
    %48 = arith.mulf %45, %47 : vector<8x8xf32>
    %49 = vector.extract_strided_slice %14 {offsets = [8, 0], sizes = [8, 32], strides = [1, 1]} : vector<32x32xf32> to vector<8x32xf32>
    %cst_24 = arith.constant dense<0.000000e+00> : vector<8x32xf32>
    %50 = tpu.matmul %48, %49, %cst_24 {dimension_numbers = #tpu.dot_dimension_numbers<[1], [0], [0], [1], [0, 0, 1, 1], [], []>} : vector<8x8xf32>, vector<8x32xf32>, vector<8x32xf32> -> vector<8x32xf32>
    %51 = arith.addf %33, %50 : vector<8x32xf32>
    %52 = vector.extract_strided_slice %11 {offsets = [0, 16], sizes = [8, 8], strides = [1, 1]} : vector<8x32xf32> to vector<8x8xf32>
    %53 = vector.extract_strided_slice %12 {offsets = [0, 16], sizes = [8, 8], strides = [1, 1]} : vector<8x32xf32> to vector<8x8xf32>
    %54 = vector.extract_strided_slice %13 {offsets = [0, 16], sizes = [8, 8], strides = [1, 1]} : vector<8x32xf32> to vector<8x8xf32>
    %cst_25 = arith.constant dense<0.000000e+00> : vector<8x8xf32>
    %55 = tpu.matmul %52, %53, %cst_25 {dimension_numbers = #tpu.dot_dimension_numbers<[1], [1], [0], [0], [0, 0, 1, 0], [], []>} : vector<8x8xf32>, vector<8x8xf32>, vector<8x8xf32> -> vector<8x8xf32>
    %cst_26 = arith.constant dense<0xFF800000> : vector<8xf32>
    %56 = vector.multi_reduction <maximumf>, %55, %cst_26 [1] : vector<8x8xf32> to vector<8xf32>
    %57 = vector.shape_cast %56 : vector<8xf32> to vector<8x1xf32>
    %58 = vector.broadcast %57 : vector<8x1xf32> to vector<8x8xf32>
    %59 = arith.subf %55, %58 : vector<8x8xf32>
    %60 = math.exp %59 : vector<8x8xf32>
    %cst_27 = arith.constant dense<0.000000e+00> : vector<8xf32>
    %61 = vector.multi_reduction <add>, %60, %cst_27 [1] : vector<8x8xf32> to vector<8xf32>
    %62 = vector.shape_cast %61 : vector<8xf32> to vector<8x1xf32>
    %cst_28 = arith.constant dense<0.000000e+00> : vector<8x8xf32>
    %63 = tpu.matmul %60, %54, %cst_28 {dimension_numbers = #tpu.dot_dimension_numbers<[1], [0], [0], [1], [0, 0, 1, 1], [], []>} : vector<8x8xf32>, vector<8x8xf32>, vector<8x8xf32> -> vector<8x8xf32>
    %64 = tpu.reciprocal %62 {approx = true} : vector<8x1xf32> -> vector<8x1xf32>
    %65 = vector.broadcast %64 : vector<8x1xf32> to vector<8x8xf32>
    %66 = arith.mulf %63, %65 : vector<8x8xf32>
    %67 = vector.extract_strided_slice %14 {offsets = [16, 0], sizes = [8, 32], strides = [1, 1]} : vector<32x32xf32> to vector<8x32xf32>
    %cst_29 = arith.constant dense<0.000000e+00> : vector<8x32xf32>
    %68 = tpu.matmul %66, %67, %cst_29 {dimension_numbers = #tpu.dot_dimension_numbers<[1], [0], [0], [1], [0, 0, 1, 1], [], []>} : vector<8x8xf32>, vector<8x32xf32>, vector<8x32xf32> -> vector<8x32xf32>
    %69 = arith.addf %51, %68 : vector<8x32xf32>
    %70 = vector.extract_strided_slice %11 {offsets = [0, 24], sizes = [8, 8], strides = [1, 1]} : vector<8x32xf32> to vector<8x8xf32>
    %71 = vector.extract_strided_slice %12 {offsets = [0, 24], sizes = [8, 8], strides = [1, 1]} : vector<8x32xf32> to vector<8x8xf32>
    %72 = vector.extract_strided_slice %13 {offsets = [0, 24], sizes = [8, 8], strides = [1, 1]} : vector<8x32xf32> to vector<8x8xf32>
    %cst_30 = arith.constant dense<0.000000e+00> : vector<8x8xf32>
    %73 = tpu.matmul %70, %71, %cst_30 {dimension_numbers = #tpu.dot_dimension_numbers<[1], [1], [0], [0], [0, 0, 1, 0], [], []>} : vector<8x8xf32>, vector<8x8xf32>, vector<8x8xf32> -> vector<8x8xf32>
    %cst_31 = arith.constant dense<0xFF800000> : vector<8xf32>
    %74 = vector.multi_reduction <maximumf>, %73, %cst_31 [1] : vector<8x8xf32> to vector<8xf32>
    %75 = vector.shape_cast %74 : vector<8xf32> to vector<8x1xf32>
    %76 = vector.broadcast %75 : vector<8x1xf32> to vector<8x8xf32>
    %77 = arith.subf %73, %76 : vector<8x8xf32>
    %78 = math.exp %77 : vector<8x8xf32>
    %cst_32 = arith.constant dense<0.000000e+00> : vector<8xf32>
    %79 = vector.multi_reduction <add>, %78, %cst_32 [1] : vector<8x8xf32> to vector<8xf32>
    %80 = vector.shape_cast %79 : vector<8xf32> to vector<8x1xf32>
    %cst_33 = arith.constant dense<0.000000e+00> : vector<8x8xf32>
    %81 = tpu.matmul %78, %72, %cst_33 {dimension_numbers = #tpu.dot_dimension_numbers<[1], [0], [0], [1], [0, 0, 1, 1], [], []>} : vector<8x8xf32>, vector<8x8xf32>, vector<8x8xf32> -> vector<8x8xf32>
    %82 = tpu.reciprocal %80 {approx = true} : vector<8x1xf32> -> vector<8x1xf32>
    %83 = vector.broadcast %82 : vector<8x1xf32> to vector<8x8xf32>
    %84 = arith.mulf %81, %83 : vector<8x8xf32>
    %85 = vector.extract_strided_slice %14 {offsets = [24, 0], sizes = [8, 32], strides = [1, 1]} : vector<32x32xf32> to vector<8x32xf32>
    %cst_34 = arith.constant dense<0.000000e+00> : vector<8x32xf32>
    %86 = tpu.matmul %84, %85, %cst_34 {dimension_numbers = #tpu.dot_dimension_numbers<[1], [0], [0], [1], [0, 0, 1, 1], [], []>} : vector<8x8xf32>, vector<8x32xf32>, vector<8x32xf32> -> vector<8x32xf32>
    %87 = arith.addf %69, %86 : vector<8x32xf32>
    %c0_35 = arith.constant 0 : index
    %c0_36 = arith.constant 0 : index
    %88 = vector.load %arg9[%c0_35, %c0_36] : memref<1x32xf32, #tpu.memory_space<vmem>>, vector<1x32xf32>
    %89 = vector.broadcast %88 : vector<1x32xf32> to vector<8x32xf32>
    %90 = arith.addf %87, %89 : vector<8x32xf32>
    %c0_37 = arith.constant 0 : index
    %c0_38 = arith.constant 0 : index
    %c0_39 = arith.constant 0 : index
    %91 = vector.load %arg10[%c0_37, %c0_38, %c0_39] : memref<1x8x32xf32, #tpu.memory_space<vmem>>, vector<1x8x32xf32>
    %92 = vector.shape_cast %91 : vector<1x8x32xf32> to vector<8x32xf32>
    %93 = vector.shape_cast %90 : vector<8x32xf32> to vector<1x8x32xf32>
    tpu.vector_store %arg10[%c0_37, %c0_38, %c0_39], %93 {strides = array<i32>} : memref<1x8x32xf32, #tpu.memory_space<vmem>>, vector<1x8x32xf32>,
    return
  }
  func.func @transform_0(%arg0: i32, %arg1: i32) -> (i32, i32, i32) {
    %c0_i32 = arith.constant 0 : i32
    %c0_i32_0 = arith.constant 0 : i32
    return %arg0, %arg1, %c0_i32 : i32, i32, i32
  }
  func.func @transform_1(%arg0: i32, %arg1: i32) -> (i32, i32, i32) {
    %c0_i32 = arith.constant 0 : i32
    %c0_i32_0 = arith.constant 0 : i32
    %c0_i32_1 = arith.constant 0 : i32
    return %arg0, %c0_i32, %c0_i32_0 : i32, i32, i32
  }
  func.func @transform_2(%arg0: i32, %arg1: i32) -> (i32, i32) {
    %c0_i32 = arith.constant 0 : i32
    %c0_i32_0 = arith.constant 0 : i32
    %c0_i32_1 = arith.constant 0 : i32
    return %c0_i32, %c0_i32_0 : i32, i32
  }
  func.func @transform_3(%arg0: i32, %arg1: i32) -> (i32, i32) {
    %c0_i32 = arith.constant 0 : i32
    %c0_i32_0 = arith.constant 0 : i32
    %c0_i32_1 = arith.constant 0 : i32
    return %c0_i32, %c0_i32_0 : i32, i32
  }
  func.func @transform_4(%arg0: i32, %arg1: i32) -> (i32, i32) {
    %c0_i32 = arith.constant 0 : i32
    %c0_i32_0 = arith.constant 0 : i32
    %c0_i32_1 = arith.constant 0 : i32
    return %c0_i32, %c0_i32_0 : i32, i32
  }
  func.func @transform_5(%arg0: i32, %arg1: i32) -> (i32, i32) {
    %c0_i32 = arith.constant 0 : i32
    %c0_i32_0 = arith.constant 0 : i32
    %c0_i32_1 = arith.constant 0 : i32
    return %c0_i32, %c0_i32_0 : i32, i32
  }
  func.func @transform_6(%arg0: i32, %arg1: i32) -> (i32, i32) {
    %c0_i32 = arith.constant 0 : i32
    %c0_i32_0 = arith.constant 0 : i32
    %c0_i32_1 = arith.constant 0 : i32
    return %c0_i32, %c0_i32_0 : i32, i32
  }
  func.func @transform_7(%arg0: i32, %arg1: i32) -> (i32, i32) {
    %c0_i32 = arith.constant 0 : i32
    %c0_i32_0 = arith.constant 0 : i32
    %c0_i32_1 = arith.constant 0 : i32
    return %c0_i32, %c0_i32_0 : i32, i32
  }
  func.func @transform_8(%arg0: i32, %arg1: i32) -> (i32, i32, i32) {
    %c0_i32 = arith.constant 0 : i32
    %c0_i32_0 = arith.constant 0 : i32
    return %arg0, %arg1, %c0_i32 : i32, i32, i32
  }
}

</mosaic_0001>

<bundles_post_ra>
// kernel: tpu_custom_call.1
= control target key start
LH: loop header
LB: loop body
LE: loop exit
PB: predicated region body
PF: predicated region fallthrough
CT: control target
= control target key end

     0   :  { %s2722_s0 = inlined_call_operand.hbm [shape: f32[2,8,32], index: 0, kind: input, shape index: {}]   ;;  %s2723_s1 = inlined_call_operand.hbm [shape: f32[2,8,32], index: 1, kind: input, shape index: {}]   ;;  %s2724_s2 = inlined_call_operand.hbm [shape: f32[32,32], index: 2, kind: input, shape index: {}]   ;;  %s2725_s3 = inlined_call_operand.hbm [shape: f32[32,64], index: 3, kind: input, shape index: {}]   ;;  %s2726_s4 = inlined_call_operand.hbm [shape: f32[32,32], index: 4, kind: input, shape index: {}]   ;;  %s2727_s5 = inlined_call_operand.vmem [shape: f32[1,32], index: 5, kind: input, shape index: {}]   ;;  %s2728_s6 = inlined_call_operand.vmem [shape: f32[1,64], index: 6, kind: input, shape index: {}]   ;;  %s2729_s7 = inlined_call_operand.vmem [shape: f32[1,32], index: 7, kind: input, shape index: {}]   ;;  %s2730_s8 = inlined_call_operand.hbm [shape: f32[2,8,32], index: 8, kind: output, shape index: {}]  }
   0x1   :  { %2738 = sst [smem:[#allocation21_spill]] %s2724_s2 }
   0x2   :  { %2739 = sst [smem:[#allocation22_spill]] %s2725_s3 }
   0x3   :  { %2740 = sst [smem:[#allocation23_spill]] %s2726_s4 }
   0x4   :  { %2741 = sst [smem:[#allocation24_spill]] %s2729_s7 }
   0x5   :  { %2742 = sst [smem:[#allocation25_spill]] %s2730_s8 }
   0x6   :  { %13 = vsyncpa [#allocation5], 0 }
   0x7   :  { %15 = vsyncpa [#allocation5 + $0x1], 0 }
   0x8   :  { %16 = vsyncpa [#allocation8], 0 }
   0x9   :  { %18 = vsyncpa [#allocation8 + $0x1], 0 }
   0xa   :  { %19 = vsyncpa [#allocation11], 0 }
   0xb   :  { %20 = vsyncpa [#allocation6], 0 }
   0xc   :  { %22 = vsyncpa [#allocation6 + $0x1], 0  ;;  %s2307_s27 = smov 0   ;;  %s2309_s28 = smov 0  }
   0xd   :  { %s2311_s29 = smov 0   ;;  %s2313_s30 = smov 0  }
   0xe   :  { %s2315_s9 = smov 0   ;;  %s2317_s10 = smov 0  }
   0xf LB: > { %2743 = sst [smem:[#allocation19_spill]] %s2225_s27  ;;  %s2338_s11 = sadd.s32 4294967295, %s2245_s10   ;;  %s2245_s10 = sphi %s2317_s10, %s28_s10   ;;  %s2241_s9 = sphi %s2315_s9, %s2773_s9   ;;  %s2237_s30 = sphi %s2313_s30, %s2772_s30   ;;  %s2233_s29 = sphi %s2311_s29, %s2771_s29   ;;  %s2229_s28 = sphi %s2309_s28, %s2770_s28   ;;  %s2225_s27 = sphi %s2307_s27, %s2769_s27  }
  0x10   : > { %s1714_s12 = sadd.s32 4294967294, %s2245_s10   ;;  %p62_p0 = scmp.ne.s32.totalorder %s2229_s28, %s2225_s27 }
  0x11   : > { %p2731_p1 = scmp.eq.s32.totalorder %s2338_s11, 0  ;;  %p246_p3 = scmp.eq.s32.totalorder %s1714_s12, 1 }
  0x12   : > { %p1715_p5 = scmp.ge.s32.totalorder %s2245_s10, 1  ;;  %p253_p7 = scmp.lt.s32.totalorder %s2245_s10, 3 }
  0x13   : > { %p2347_p4 = por %p2731_p1, %p62_p0  ;;  %p2352_p6 = por %p246_p3, %p62_p0 }
  0x14   : > { %p2357_p8 = pnand %p1715_p5, %p253_p7  ;;  %s2247_s16 = smov [#allocation9]  }
  0x15   : > { %s2744_s13 = scalar_select %p2347_p4, 1, 0 }
  0x16   : > { %s2745_s14 = scalar_select %p2352_p6, 1, 0 }
  0x17   : > { %s2747_s15 = scalar_select %p2357_p8, 1, 0 }
  0x18   : > { %2746 = sst [smem:[#allocation20_spill]] %s2745_s14  ;;  %s265_s17 = sshll.u32 %s2247_s16, 4  ;;  %s2361_s17 = int_to_ptr.vmem [resolvable:$true] %s265_s17 }
  0x19   : > { %p1902_p9 = pneg %p2357_p8  ;;  %s2248_s19 = smov [#allocation10]  }
  0x1a   : > { %s278_s20 = sshll.u32 %s2248_s19, 4  ;;  %s2249_s21 = smov [#allocation12]   ;;  %s2372_s20 = int_to_ptr.vmem [resolvable:$true] %s278_s20 }
  0x1b   : > { %p2368_p11 = pnand %p1902_p9, %p2731_p1  ;;  %s2374_s22 = sshll.u32 %s2249_s21, 4  ;;  %s292_s22 = int_to_ptr.vmem [resolvable:$true] %s2374_s22 }
  0x1c   : > { %s2749_s2 = sld [smem:[#allocation21_spill]] }
  0x1d   : > { %p2384_p13 = pneg %p2368_p11 }
  0x22   : > { %s2007_s25 = scalar_lea.hbm %s2749_s2, 512 }
  0x23   : > { %p2008_p12 = scmp.ne.s32.totalorder %s2749_s2, %s2007_s25  ;;  %p2014_p5 = scmp.lt.u32.totalorder %s2007_s25, %s2749_s2 }
  0x25   : > { %p2010_p0 = pnand %p2384_p13, %p2008_p12 }
  0x27   : > { %p2011_p3 = pneg %p2010_p0 }
  0x29   : > { %p2016_p7 = pnand %p2014_p5, %p2011_p3 }
  0x2b   : > { %2019 = shalt.err (!%p2016_p7)
}
  0x2c   : > { %s2020_s23 = scalar_lea.vmem %s2361_s17, 512  ;;  %p2028_p2 = scmp.lt.s32.totalorder %s2361_s17, %s2361_s17 }
  0x2d   : > { %p2021_p9 = scmp.ne.s32.totalorder %s2361_s17, %s2020_s23  ;;  %p2029_p6 = scmp.lt.s32.totalorder %s2020_s23, %s2020_s23 }
  0x2f   : > { %p2023_p10 = pnand %p2021_p9, %p2384_p13  ;;  %p2030_p12 = por %p2029_p6, %p2028_p2 }
  0x31   : > { %p2024_p1 = pneg %p2023_p10 }
  0x33   : > { %p2031_p0 = pnand %p2030_p12, %p2024_p1 }
  0x35   : > { %2034 = shalt.err (!%p2031_p0)
}
  0x36   : > { %s2250_s24 = smov 128   ;;  %s2251_s25 = smov 8  }
  0x37   : > { %1905 = dma.hbm_to_vmem [thread:$0]  (!%p2368_p11), %s2749_s2, 512, %s2361_s17, [#allocation8], %s2250_s24, %s2250_s24, %s2251_s25  }
  0x38   : > { %s2751_s3 = sld [smem:[#allocation22_spill]] }
  0x3e   : > { %s2035_s23 = scalar_lea.hbm %s2751_s3, 512 }
  0x3f   : > { %p2036_p1 = scmp.ne.s32.totalorder %s2751_s3, %s2035_s23  ;;  %p2042_p10 = scmp.lt.u32.totalorder %s2035_s23, %s2751_s3 }
  0x41   : > { %p2038_p2 = pnand %p2036_p1, %p2384_p13 }
  0x43   : > { %p2039_p6 = pneg %p2038_p2 }
  0x45   : > { %p2044_p3 = pnand %p2042_p10, %p2039_p6 }
  0x47   : > { %2047 = shalt.err (!%p2044_p3)
}
  0x48   : > { %s2048_s17 = scalar_lea.vmem %s2372_s20, 512  ;;  %p2056_p12 = scmp.lt.s32.totalorder %s2372_s20, %s2372_s20 }
  0x49   : > { %p2049_p5 = scmp.ne.s32.totalorder %s2372_s20, %s2048_s17  ;;  %p2057_p0 = scmp.lt.s32.totalorder %s2048_s17, %s2048_s17 }
  0x4b   : > { %p2051_p7 = pnand %p2049_p5, %p2384_p13  ;;  %p2058_p1 = por %p2057_p0, %p2056_p12 }
  0x4d   : > { %p2052_p9 = pneg %p2051_p7 }
  0x4f   : > { %p2059_p2 = pnand %p2058_p1, %p2052_p9 }
  0x51   : > { %2062 = shalt.err (!%p2059_p2)
}
  0x52   : > { %1908 = dma.hbm_to_vmem [thread:$0]  (!%p2368_p11), %s2751_s3, 512, %s2372_s20, [#allocation11], %s2250_s24, %s2250_s24, %s2251_s25  }
  0x53   : > { %s2752_s4 = sld [smem:[#allocation23_spill]] }
  0x59   : > { %s2063_s26 = scalar_lea.hbm %s2752_s4, 512 }
  0x5a   : > { %p2064_p6 = scmp.ne.s32.totalorder %s2752_s4, %s2063_s26  ;;  %p2070_p5 = scmp.lt.u32.totalorder %s2063_s26, %s2752_s4 }
  0x5c   : > { %p2066_p10 = pnand %p2064_p6, %p2384_p13 }
  0x5e   : > { %p2067_p3 = pneg %p2066_p10 }
  0x60   : > { %p2072_p7 = pnand %p2070_p5, %p2067_p3 }
  0x62   : > { %2075 = shalt.err (!%p2072_p7)
}
  0x63   : > { %s2076_s17 = scalar_lea.vmem %s292_s22, 512  ;;  %p2084_p1 = scmp.lt.s32.totalorder %s292_s22, %s292_s22 }
  0x64   : > { %p2077_p9 = scmp.ne.s32.totalorder %s292_s22, %s2076_s17  ;;  %p2085_p2 = scmp.lt.s32.totalorder %s2076_s17, %s2076_s17 }
  0x66   : > { %p2079_p12 = pnand %p2077_p9, %p2384_p13  ;;  %p2086_p4 = por %p2085_p2, %p2084_p1 }
  0x68   : > { %p2080_p0 = pneg %p2079_p12 }
  0x6a   : > { %p2087_p8 = pnand %p2086_p4, %p2080_p0 }
  0x6c   : > { %2090 = shalt.err (!%p2087_p8)
}
  0x6d   : > { %1911 = dma.hbm_to_vmem [thread:$0]  (!%p2368_p11), %s2752_s4, 512, %s292_s22, [#allocation11], %s2250_s24, %s2250_s24, %s2251_s25  }
  0x6e   : > { %s49_s16 = sadd.s32 1, %s2233_s29  ;;  %s40_s18 = sadd.s32 1, %s2241_s9 }
  0x6f   : > { %p56_p4 = scmp.ne.s32.totalorder %s2233_s29, %s2229_s28  ;;  %p42_p8 = scmp.ge.s32.totalorder %s40_s18, 2 }
  0x70   : > { %p57_p13 = scmp.eq.s32.totalorder %s2245_s10, 0  ;;  %p2753_p6 = scmp.eq.s32.totalorder %s2338_s11, 1 }
  0x71   : > { %p1926_p3 = scmp.lt.s32.totalorder %s2245_s10, 2  ;;  %s2775_s18 = smov (%p42_p8, %s40_s18), 0 }
  0x72   : > { %p2463_p10 = por %p2753_p6, %p56_p4  ;;  %p58_p5 = por %p57_p13, %p56_p4 }
  0x73   : > { %s314_s27 = sand.u32 1, %s2233_s29   ;;  %s44_s14 = ssub.s32 %s2241_s9, %s2775_s18 }
  0x74   : > { %s2754_s8 = scalar_select %p2463_p10, 1, 0 }
  0x75   : > { %p47_p11 = scmp.eq.s32.totalorder %s44_s14, 0  ;;  %s2473_s22 = sshll.u32 %s314_s27, 3 }
  0x76   : > { %s1721_s24 = sshll.u32 %s2241_s9, 7  ;;  %s318_s21 = scalar_lea.vmem [#allocation4], %s2473_s22 }
  0x77   : > { %s2477_s25 = scalar_select %p47_p11, %s2233_s29, %s49_s16  }
  0x78   : > { %s2482_s19 = scalar_lea.hbm %s2722_s0, %s1721_s24  ;;  %s326_s23 = sshll.u32 %s318_s21, 4  ;;  %s2485_s23 = int_to_ptr.vmem [resolvable:$true] %s326_s23 }
  0x79   : > { %p2489_p7 = pnand %p1926_p3, %p58_p5  ;;  %s2496_s16 = scalar_lea.hbm %s2723_s1, %s1721_s24 }
  0x7a   : > { %s333_s14 = sand.u32 1, %s2245_s10   ;;  %s315_s26 = scalar_lea.sflag [#allocation5], %s314_s27 }
  0x7b   : > { %s2091_s12 = scalar_lea.hbm %s2482_s19, 128  ;;  %p2093_p12 = pneg %p2489_p7 }
  0x7c   : > { %p2092_p9 = scmp.ne.s32.totalorder %s2482_s19, %s2091_s12  ;;  %s2096_s3 = scalar_lea.hbm %s2722_s0, 256 }
  0x7d   : > { %p2097_p2 = scmp.lt.u32.totalorder %s2482_s19, %s2722_s0  ;;  %p2098_p4 = scmp.lt.u32.totalorder %s2096_s3, %s2091_s12 }
  0x7e   : > { %p2094_p0 = pnand %p2093_p12, %p2092_p9  ;;  %p2100_p13 = scmp.lt.u32.totalorder %s2091_s12, %s2482_s19 }
  0x7f   : > { %p2099_p8 = por %p2098_p4, %p2097_p2 }
  0x80   : > { %p2095_p1 = pneg %p2094_p0 }
  0x81   : > { %p2101_p6 = por %p2100_p13, %p2099_p8 }
  0x83   : > { %p2102_p3 = pnand %p2101_p6, %p2095_p1 }
  0x85   : > { %2105 = shalt.err (!%p2102_p3)
}
  0x86   : > { %s2106_s27 = scalar_lea.vmem %s2485_s23, 128  ;;  %s2252_s2 = smov [#allocation4]  }
  0x87   : > { %p2107_p5 = scmp.ne.s32.totalorder %s2485_s23, %s2106_s27  ;;  %s2111_s24 = sshll.u32 %s2252_s2, 4  ;;  %s2112_s24 = int_to_ptr.vmem [resolvable:$false] %s2111_s24 }
  0x88   : > { %s2113_s4 = scalar_lea.vmem %s2112_s24, 256  ;;  %p2114_p0 = scmp.lt.s32.totalorder %s2485_s23, %s2112_s24 }
  0x89   : > { %p2109_p11 = pnand %p2107_p5, %p2093_p12  ;;  %p2115_p2 = scmp.lt.s32.totalorder %s2113_s4, %s2106_s27 }
  0x8b   : > { %p2110_p9 = pneg %p2109_p11  ;;  %p2116_p4 = por %p2115_p2, %p2114_p0 }
  0x8d   : > { %p2117_p8 = pnand %p2116_p4, %p2110_p9 }
  0x8f   : > { %2120 = shalt.err (!%p2117_p8)
}
  0x90   : > { %1915 = dma.hbm_to_vmem [thread:$0]  (!%p2489_p7), %s2482_s19, 128, %s2485_s23, %s315_s26  }
  0x91   : > { %s337_s3 = scalar_lea.vmem [#allocation7], %s2473_s22  ;;  %s334_s12 = scalar_lea.sflag [#allocation8], %s333_s14 }
  0x92   : > { %s344_s7 = sshll.u32 %s337_s3, 4  ;;  %s2121_s21 = scalar_lea.hbm %s2496_s16, 128  ;;  %s345_s7 = int_to_ptr.vmem [resolvable:$true] %s344_s7 }
  0x93   : > { %p2122_p1 = scmp.ne.s32.totalorder %s2496_s16, %s2121_s21  ;;  %s2126_s2 = scalar_lea.hbm %s2723_s1, 256 }
  0x94   : > { %p2127_p3 = scmp.lt.u32.totalorder %s2496_s16, %s2723_s1  ;;  %p2128_p5 = scmp.lt.u32.totalorder %s2126_s2, %s2121_s21 }
  0x95   : > { %p2124_p13 = pnand %p2122_p1, %p2093_p12  ;;  %p2130_p9 = scmp.lt.u32.totalorder %s2121_s21, %s2496_s16 }
  0x96   : > { %p2129_p11 = por %p2128_p5, %p2127_p3 }
  0x97   : > { %p2125_p6 = pneg %p2124_p13 }
  0x98   : > { %p2131_p0 = por %p2130_p9, %p2129_p11 }
  0x9a   : > { %p2132_p2 = pnand %p2131_p0, %p2125_p6 }
  0x9c   : > { %2135 = shalt.err (!%p2132_p2)
}
  0x9d   : > { %s2136_s22 = scalar_lea.vmem %s345_s7, 128  ;;  %s2253_s19 = smov [#allocation7]  }
  0x9e   : > { %p2137_p4 = scmp.ne.s32.totalorder %s345_s7, %s2136_s22  ;;  %s2141_s23 = sshll.u32 %s2253_s19, 4  ;;  %s2142_s23 = int_to_ptr.vmem [resolvable:$false] %s2141_s23 }
  0x9f   : > { %s2143_s14 = scalar_lea.vmem %s2142_s23, 256  ;;  %p2144_p13 = scmp.lt.s32.totalorder %s345_s7, %s2142_s23 }
  0xa0   : > { %p2139_p8 = pnand %p2137_p4, %p2093_p12  ;;  %p2145_p10 = scmp.lt.s32.totalorder %s2143_s14, %s2136_s22 }
  0xa2   : > { %p2140_p1 = pneg %p2139_p8  ;;  %p2146_p3 = por %p2145_p10, %p2144_p13 }
  0xa4   : > { %p2147_p5 = pnand %p2146_p3, %p2140_p1 }
  0xa6   : > { %2150 = shalt.err (!%p2147_p5)
}
  0xa7   : > { %1918 = dma.hbm_to_vmem [thread:$0]  (!%p2489_p7), %s2496_s16, 128, %s345_s7, %s334_s12  }
  0xa8   : > { %p2756_p6 = scmp.ne.s32.totalorder %s2747_s15, 0 }
  0xa9   : > { %s2549_s26 = sand.u32 (!%p2756_p6), 1, %s2229_s28   ;;  %p2757_p10 = scmp.ne.s32.totalorder (!%p2756_p6), %s2744_s13, 0 }
  0xaa   : > { %353 = sbr.rel (%p2756_p6) target bundleno = 2314 (0x90a), region = 52  ;;  %s2552_s3 = sshll.u32 (!%p2756_p6), %s2549_s26, 3 }
  0xab   : > { %s356_s21 = scalar_lea.sflag (!%p2756_p6), [#allocation5], %s2549_s26  ;;  %s359_s20 = scalar_lea.vmem (!%p2756_p6), [#allocation4], %s2552_s3 }
  0xb1   : > { %2204 = dma.done.wait (%p2757_p10), %s356_s21, 128  }
  0xb2   : > { %2206 = vsyncadd (%p2757_p10), %s356_s21, 4294967168  ;;  %s364_s15 = sand.u32 1, %s2338_s11   ;;  %s368_s16 = scalar_lea.vmem [#allocation7], %s2552_s3 }
  0xb3   : > { %s365_s17 = scalar_lea.sflag [#allocation8], %s364_s15 }
  0xb4   : > { %2208 = dma.done.wait (%p2757_p10), %s365_s17, 128  }
  0xb5   : > { %2210 = vsyncadd (%p2757_p10), %s365_s17, 4294967168  ;;  %p2758_p7 = scmp.eq.s32.totalorder %s2338_s11, 0 }
  0xb7   : > { %2212 = dma.done.wait (%p2758_p7), [#allocation8], 512   ;;  %p2759_p12 = pmov %p2758_p7 }
  0xb8   : > { %p2760_p11 = pmov %p2758_p7 }
  0xb9   : > { %2214 = vsyncadd (%p2759_p12), [#allocation8], 4294966784 }
  0xba   : > { %2216 = dma.done.wait (%p2760_p11), [#allocation11], 1024   ;;  %p2761_p9 = pmov %p2758_p7 }
  0xbb   : > { %v2254_v0 = vmov 0.0|0.0   ;;  %vm2255_vm0 = vmmov 0   ;;  %v2256_v1 = vmov 0.0   ;;  %v423_v2 = vld [vmem:[#allocation10] sm:$0xff]  ;;  %v424_v3 = vld [vmem:[#allocation10 + $0x8] sm:$0xff]  ;;  %v425_v4 = vld [vmem:[#allocation10 + $0x10] sm:$0xff] }
  0xbc   : > { %2218 = vsyncadd (%p2761_p9), [#allocation11], 4294966272  ;;  %1872 = vmatprep.subr.bf16.mxu0 %v2254_v0  ;;  %1798 = vmatprep.mubr.msk.f32.mxu0 %vm2255_vm0, %v2256_v1  ;;  %v1873_v5 = vpack.c.bf16 %v424_v3, %v423_v2  ;;  %v426_v6 = vld [vmem:[#allocation10 + $0x18] sm:$0xff]  ;;  %v515_v7 = vld [vmem:[#allocation9] sm:$0xff]  ;;  %vm434_vm1 = vcmask 261120   ;;  %s2257_s7 = smov 96  }
  0xbd   : > { %1878 = vmatprep.subr.bf16.mxu1 %v2254_v0  ;;  %1809 = vmatprep.mubr.msk.f32.mxu1 %vm2255_vm0, %v2256_v1  ;;  %v516_v8 = vld [vmem:[#allocation9 + $0x8] sm:$0xff]  ;;  %v517_v9 = vld [vmem:[#allocation9 + $0x10] sm:$0xff]  ;;  %v518_v10 = vld [vmem:[#allocation9 + $0x18] sm:$0xff]  ;;  %v1876_v11 = vpack.c.bf16 %v426_v6, %v425_v4  ;;  %vm607_vm2 = vcmask 64512   ;;  %s2258_s2 = smov 120   ;;  %s2259_s24 = smov 112  }
  0xbe   : > { %1874 = vmatpush3.bf16.msra.mxu0 %v1873_v5  ;;  %v1879_v12 = vpack.c.bf16 %v516_v8, %v515_v7  ;;  %v1882_v13 = vpack.c.bf16 %v518_v10, %v517_v9  ;;  %v422_v14 = vld [vmem:[%s368_s16] sm:$0xff]  ;;  %v514_v15 = vld [vmem:[%s359_s20] sm:$0xff]  ;;  %s2260_s4 = smov 104   ;;  %s2762_s23 = sld [smem:[#allocation24_spill]] }
  0xbf   : > { %1875 = vmatprep.subr.bf16.mxu0 %v2254_v0  ;;  %v1731_v16 = vld [vmem:[%s2728_s6] ss:$0 sm:$0xff]  ;;  %v604_v47 = vld [vmem:[#allocation12 + $0x8] sm:$0xff]  ;;  %v603_v48 = vld [vmem:[#allocation12] sm:$0xff]  ;;  %s1753_s14 = sshll.u32 %s2237_s30, 7  ;;  %s417_s21 = scalar_lea.vmem [#allocation13], %s2552_s3 }
  0xc0   : > { %1880 = vmatpush3.bf16.msra.mxu1 %v1879_v12  ;;  %v1733_v21 = vld [vmem:[%s2727_s5] ss:$0 sm:$0xff]  ;;  %s1582_s20 = sshll.u32 %s417_s21, 4  ;;  %s2763_s16 = sld [smem:[#allocation25_spill]]  ;;  %s2674_s20 = int_to_ptr.vmem [resolvable:$true] %s1582_s20 }
  0xc1   : > { %1881 = vmatprep.subr.bf16.mxu1 %v2254_v0  ;;  %s1568_s13 = scalar_lea.sflag [#allocation6], %s2549_s26  ;;  %p2764_p2 = scmp.ne.s32.totalorder %s2754_s8, 0 }
  0xc2   : > { %1877 = vmatpush3.bf16.msra.mxu0 %v1876_v11  ;;  %s2261_s30 = smov [#allocation13]  }
  0xc3   : > { %1812 = vmatprep.subr.mxu0 %v2256_v1  ;;  %s2155_s3 = sshll.u32 %s2261_s30, 4  ;;  %s2156_s3 = int_to_ptr.vmem [resolvable:$false] %s2155_s3 }
  0xc4   : > { %1883 = vmatpush3.bf16.msra.mxu1 %v1882_v13  ;;  %s2157_s12 = scalar_lea.vmem %s2156_s3, 256  ;;  %p2158_p1 = scmp.lt.s32.totalorder %s2674_s20, %s2156_s3 }
  0xc5   : > { %1799 = vmatmul.mubr.msk.f32.vlgmr.msra.gmra.mrb[0].mxu0 %vm434_vm1, %v422_v14  ;;  %1817 = vmatprep.subr.mxu1 %v2256_v1  ;;  %v605_v14 = vld [vmem:[#allocation12 + $0x10] sm:$0xff] }
  0xc6   : > { %1814 = vmatprep.mubr.msk.f32.mxu0 %vm2255_vm0, %v2256_v1  ;;  %s2672_s11 = scalar_lea.hbm %s2763_s16, %s1753_s14 }
  0xc7   : > { %1810 = vmatmul.mubr.msk.f32.vlgmr.msra.gmra.mrb[0].mxu1 %vm434_vm1, %v514_v15 }
  0xc8   : > { %1819 = vmatprep.mubr.msk.f32.mxu1 %vm2255_vm0, %v2256_v1 }
 0x198   : > { %v504_v17 = vpop.f32.mrb[0].mxu0 }
 0x199   : > { %v505_v18 = vadd.f32 %v1731_v16, %v504_v17  ;;  %v1800_v19 = vpop.f32.mrb[1].mxu0 }
 0x19a   : > { %v596_v20 = vpop.f32.mrb[0].mxu1 }
 0x19b   : > { %508 = vst.msk [vmem:[#allocation2] sm:$0xff] %vm434_vm1, %v505_v18  ;;  %510 = vrot.lane.b32.xlu1 %v505_v18, %s2257_s7  ;;  %v1811_v22 = vpop.f32.mrb[1].mxu1  ;;  %v597_v23 = vadd.f32 %v1733_v21, %v596_v20  ;;  %s2151_s7 = scalar_lea.vmem %s2674_s20, 128 }
 0x19c   : > { %p2152_p0 = scmp.ne.s32.totalorder %s2674_s20, %s2151_s7  ;;  %p2159_p13 = scmp.lt.s32.totalorder %s2157_s12, %s2151_s7 }
 0x19d   : > { %v600_v24 = vmul.f32 0.35355338, %v597_v23 }
 0x19e   : > { %p2153_p4 = pnand %p2152_p0, %p2764_p2  ;;  %p2160_p3 = por %p2159_p13, %p2158_p1 }
 0x1a0   : > { %p2154_p8 = pneg %p2153_p4 }
 0x1a2   : > { %v601_v25 = vld [vmem:[#allocation2] sm:$0xff]  ;;  %p2161_p5 = pnand %p2160_p3, %p2154_p8 }
 0x1a3   : > { %770 = vrot.lane.b32.xlu0 %v601_v25, %s2258_s2  ;;  %1813 = vmatpush3.xpose.msk.msra.mxu0 %vm607_vm2, %v601_v25 }
 0x1a4   : > { %1822 = vmatprep.subr.mxu0 %v2256_v1 }
 0x1a6   : > { %1815 = vmatmul.mubr.msk.f32.vlgmr.msra.gmra.mrb[2].mxu0 %vm607_vm2, %v600_v24 }
 0x1a7   : > { %768 = vrot.lane.b32.xlu0 %v600_v24, %s2258_s2  ;;  %1824 = vmatprep.mubr.msk.f32.mxu0 %vm2255_vm0, %v2256_v1 }
 0x20d   : > { %v511_v26 = vpop.permute.xlu1 %510 }
 0x20e   : > { %513 = vst.msk [vmem:[#allocation3] sm:$0xff] %vm434_vm1, %v511_v26 }
 0x215   : > { %v771_v27 = vpop.permute.xlu0 %770  ;;  %v2603_v28 = vld [vmem:[#allocation3] sm:$0xff] }
 0x216   : > { %1818 = vmatpush3.msra.mxu1 %v2603_v28  ;;  %1823 = vmatpush3.xpose.msk.msra.mxu0 %vm607_vm2, %v771_v27 }
 0x217   : > { %1827 = vmatprep.subr.mxu1 %v2256_v1  ;;  %1832 = vmatprep.subr.mxu0 %v2256_v1 }
 0x219   : > { %v769_v29 = vpop.permute.xlu0 %768 }
 0x21a   : > { %1825 = vmatmul.mubr.msk.f32.vlgmr.msra.gmra.mrb[4].mxu0 %vm607_vm2, %v769_v29  ;;  %v606_v29 = vld [vmem:[#allocation12 + $0x18] sm:$0xff] }
 0x21b   : > { %1834 = vmatprep.mubr.msk.f32.mxu0 %vm2255_vm0, %v2256_v1  ;;  %1833 = vmatpush3.msra.mxu0 %v604_v47 }
 0x21c   : > { %1842 = vmatprep.subr.mxu0 %v2256_v1 }
 0x279   : > { %v680_v30 = vpop.f32.mrb[2].mxu0 }
 0x27a   : > { %v1816_v31 = vpop.f32.mrb[3].mxu0  ;;  %v684_v32 = vsel %vm607_vm2, %v680_v30, -inf }
 0x27b   : > { %685 = vmax.xlane.f32.xlu1 %v684_v32 }
 0x2ed   : > { %v842_v33 = vpop.f32.mrb[4].mxu0 }
 0x2ee   : > { %v1826_v34 = vpop.f32.mrb[5].mxu0  ;;  %v846_v35 = vsel %vm607_vm2, %v842_v33, -inf }
 0x2ef   : > { %847 = vmax.xlane.f32.xlu0 %v846_v35 }
 0x305   : > { %856 = vrot.lane.b32.xlu0 %v2603_v28, %s2258_s2 }
 0x308   : > { %v686_v36 = vpop.xlane.xlu1 %685 }
 0x309   : > { %v687_v37 = vsub.f32 %v680_v30, %v686_v36  ;;  %1080 = vrot.lane.b32.xlu0 %v600_v24, %s2259_s24 }
 0x30b   : > { %v688_v38 = vmul.f32 1.442695, %v687_v37 }
 0x30d   : > { %1991 = vpow2.f32 %v688_v38  ;;  %v1751_v38 = vld [vmem:[%s2762_s23] ss:$0 sm:$0xff] }
 0x317   : > { %v1992_v39 = vpop.eup %1991 }
 0x318   : > { %1820 = vmatmul.mubr.msk.f32.vlgmr.msra.gmra.mrb[2].mxu1 %vm607_vm2, %v1992_v39  ;;  %v690_v46 = vsel %vm607_vm2, %v1992_v39, 0.0 }
 0x319   : > { %1829 = vmatprep.mubr.msk.f32.mxu1 %vm2255_vm0, %v2256_v1 }
 0x37c   : > { %v848_v40 = vpop.xlane.xlu0 %847 }
 0x37d   : > { %v849_v41 = vsub.f32 %v842_v33, %v848_v40 }
 0x37f   : > { %v850_v42 = vmul.f32 1.442695, %v849_v41 }
 0x380   : > { %v857_v43 = vpop.permute.xlu0 %856 }
 0x381   : > { %1993 = vpow2.f32 %v850_v42  ;;  %1828 = vmatpush3.msra.mxu1 %v857_v43 }
 0x382   : > { %1837 = vmatprep.subr.mxu1 %v2256_v1 }
 0x384   : > { %v1081_v60 = vpop.permute.xlu0 %1080 }
 0x38b   : > { %v1994_v44 = vpop.eup %1993 }
 0x38c   : > { %1830 = vmatmul.mubr.msk.f32.vlgmr.msra.gmra.mrb[4].mxu1 %vm607_vm2, %v1994_v44  ;;  %v852_v45 = vsel %vm607_vm2, %v1994_v44, 0.0 }
 0x38d   : > { %853 = vadd.xlane.f32.xlu1 %v852_v45  ;;  %1839 = vmatprep.mubr.msk.f32.mxu1 %vm2255_vm0, %v2256_v1 }
 0x38e   : > { %1838 = vmatpush3.msra.mxu1 %v603_v48 }
 0x38f   : > { %1847 = vmatprep.subr.mxu1 %v2256_v1 }
 0x39e   : > { %1082 = vrot.lane.b32.xlu1 %v601_v25, %s2259_s24 }
 0x3c2   : > { %691 = vadd.xlane.f32.xlu1 %v690_v46 }
 0x3d3   : > { %1321 = vrot.lane.b32.xlu1 %v601_v25, %s2260_s4 }
 0x3d7   : > { %1319 = vrot.lane.b32.xlu1 %v600_v24, %s2260_s4 }
 0x3eb   : > { %v762_v49 = vpop.f32.mrb[2].mxu1 }
 0x3ec   : > { %v1821_v50 = vpop.f32.mrb[3].mxu1 }
 0x41a   : > { %v854_v51 = vpop.xlane.xlu1 %853 }
 0x41e   : > { %v1083_v52 = vpop.permute.xlu1 %1082 }
 0x44f   : > { %v692_v53 = vpop.xlane.xlu1 %691 }
 0x450   : > { %1995 = vrcp.f32 %v692_v53 }
 0x451   : > { %1997 = vrcp.f32 %v854_v51 }
 0x453   : > { %v1322_v10 = vpop.permute.xlu1 %1321 }
 0x457   : > { %v1320_v13 = vpop.permute.xlu1 %1319 }
 0x45a   : > { %v1996_v54 = vpop.eup %1995 }
 0x45b   : > { %v767_v55 = vmul.f32 %v1996_v54, %v762_v49  ;;  %v1998_v56 = vpop.eup %1997 }
 0x45d   : > { %1840 = vmatmul.mubr.msk.f32.vlgmr.msra.gmra.mrb[6].mxu1 %vm607_vm2, %v767_v55 }
 0x45e   : > { %1849 = vmatprep.mubr.msk.f32.mxu1 %vm2255_vm0, %v2256_v1 }
 0x45f   : > { %v928_v57 = vpop.f32.mrb[4].mxu1 }
 0x460   : > { %v933_v58 = vmul.f32 %v1998_v56, %v928_v57  ;;  %v1831_v59 = vpop.f32.mrb[5].mxu1 }
 0x462   : > { %1835 = vmatmul.mubr.msk.f32.vlgmr.msra.gmra.mrb[6].mxu0 %vm607_vm2, %v933_v58 }
 0x463   : > { %1843 = vmatpush3.xpose.msk.msra.mxu0 %vm607_vm2, %v1083_v52  ;;  %1844 = vmatprep.mubr.msk.f32.mxu0 %vm2255_vm0, %v2256_v1 }
 0x464   : > { %1852 = vmatprep.subr.mxu0 %v2256_v1 }
 0x466   : > { %1845 = vmatmul.mubr.msk.f32.vlgmr.msra.gmra.mrb[8].mxu0 %vm607_vm2, %v1081_v60 }
 0x467   : > { %1854 = vmatprep.mubr.msk.f32.mxu0 %vm2255_vm0, %v2256_v1  ;;  %1853 = vmatpush3.msra.mxu0 %v605_v14 }
 0x468   : > { %1862 = vmatprep.subr.mxu0 %v2256_v1 }
 0x530   : > { %v1076_v61 = vpop.f32.mrb[6].mxu1 }
 0x531   : > { %v1841_v62 = vpop.f32.mrb[7].mxu1 }
 0x535   : > { %v1003_v63 = vpop.f32.mrb[6].mxu0 }
 0x536   : > { %v1077_v0 = vadd.f32 %v1076_v61, %v1003_v63  ;;  %v1836_v2 = vpop.f32.mrb[7].mxu0 }
 0x539   : > { %v1154_v3 = vpop.f32.mrb[8].mxu0 }
 0x53a   : > { %v1846_v4 = vpop.f32.mrb[9].mxu0  ;;  %v1158_v5 = vsel %vm607_vm2, %v1154_v3, -inf }
 0x53b   : > { %1159 = vmax.xlane.f32.xlu0 %v1158_v5 }
 0x551   : > { %1167 = vrot.lane.b32.xlu0 %v2603_v28, %s2259_s24 }
 0x5c8   : > { %v1160_v6 = vpop.xlane.xlu0 %1159 }
 0x5c9   : > { %v1161_v7 = vsub.f32 %v1154_v3, %v1160_v6 }
 0x5cb   : > { %v1162_v8 = vmul.f32 1.442695, %v1161_v7 }
 0x5cc   : > { %v1168_v9 = vpop.permute.xlu0 %1167 }
 0x5cd   : > { %1999 = vpow2.f32 %v1162_v8  ;;  %1848 = vmatpush3.msra.mxu1 %v1168_v9 }
 0x5ce   : > { %1857 = vmatprep.subr.mxu1 %v2256_v1 }
 0x5d7   : > { %v2000_v11 = vpop.eup %1999 }
 0x5d8   : > { %1850 = vmatmul.mubr.msk.f32.vlgmr.msra.gmra.mrb[8].mxu1 %vm607_vm2, %v2000_v11  ;;  %v1164_v12 = vsel %vm607_vm2, %v2000_v11, 0.0 }
 0x5d9   : > { %1858 = vmatpush3.xpose.msk.msra.mxu1 %vm607_vm2, %v1322_v10  ;;  %1165 = vadd.xlane.f32.xlu0 %v1164_v12 }
 0x5da   : > { %1859 = vmatprep.mubr.msk.f32.mxu1 %vm2255_vm0, %v2256_v1  ;;  %1867 = vmatprep.subr.mxu1 %v2256_v1 }
 0x5dc   : > { %1860 = vmatmul.mubr.msk.f32.vlgmr.msra.gmra.mrb[10].mxu1 %vm607_vm2, %v1320_v13 }
 0x5dd   : > { %1869 = vmatprep.mubr.msk.f32.mxu1 %vm2255_vm0, %v2256_v1  ;;  %1868 = vmatpush3.msra.mxu1 %v606_v29 }
 0x5ef   : > { %1406 = vrot.lane.b32.xlu0 %v2603_v28, %s2260_s4 }
 0x666   : > { %v1166_v15 = vpop.xlane.xlu0 %1165 }
 0x667   : > { %2001 = vrcp.f32 %v1166_v15 }
 0x66a   : > { %v1407_v20 = vpop.permute.xlu0 %1406 }
 0x671   : > { %v2002_v16 = vpop.eup %2001 }
 0x6ab   : > { %v1239_v17 = vpop.f32.mrb[8].mxu1 }
 0x6ac   : > { %v1244_v18 = vmul.f32 %v2002_v16, %v1239_v17  ;;  %v1851_v19 = vpop.f32.mrb[9].mxu1 }
 0x6ae   : > { %1855 = vmatmul.mubr.msk.f32.vlgmr.msra.gmra.mrb[10].mxu0 %vm607_vm2, %v1244_v18 }
 0x6af   : > { %1863 = vmatpush3.msra.mxu0 %v1407_v20  ;;  %v1393_v21 = vpop.f32.mrb[10].mxu1  ;;  %1864 = vmatprep.mubr.msk.f32.mxu0 %vm2255_vm0, %v2256_v1 }
 0x6b0   : > { %v1861_v22 = vpop.f32.mrb[11].mxu1  ;;  %v1397_v23 = vsel %vm607_vm2, %v1393_v21, -inf }
 0x6b1   : > { %1398 = vmax.xlane.f32.xlu1 %v1397_v23 }
 0x73e   : > { %v1399_v24 = vpop.xlane.xlu1 %1398 }
 0x73f   : > { %v1400_v25 = vsub.f32 %v1393_v21, %v1399_v24 }
 0x741   : > { %v1401_v26 = vmul.f32 1.442695, %v1400_v25 }
 0x743   : > { %2003 = vpow2.f32 %v1401_v26 }
 0x74d   : > { %v2004_v27 = vpop.eup %2003 }
 0x74e   : > { %1865 = vmatmul.mubr.msk.f32.vlgmr.msra.gmra.mrb[12].mxu0 %vm607_vm2, %v2004_v27  ;;  %v1403_v28 = vsel %vm607_vm2, %v2004_v27, 0.0 }
 0x74f   : > { %1404 = vadd.xlane.f32.xlu1 %v1403_v28 }
 0x781   : > { %v1314_v30 = vpop.f32.mrb[10].mxu0 }
 0x782   : > { %v1318_v1 = vadd.f32 %v1314_v30, %v1077_v0  ;;  %v1856_v31 = vpop.f32.mrb[11].mxu0 }
 0x7dc   : > { %v1405_v32 = vpop.xlane.xlu1 %1404 }
 0x7dd   : > { %2005 = vrcp.f32 %v1405_v32 }
 0x7e7   : > { %v2006_v33 = vpop.eup %2005 }
 0x821   : > { %v1478_v34 = vpop.f32.mrb[12].mxu0 }
 0x822   : > { %v1483_v35 = vmul.f32 %v2006_v33, %v1478_v34  ;;  %v1866_v36 = vpop.f32.mrb[13].mxu0 }
 0x824   : > { %1870 = vmatmul.mubr.msk.f32.vlgmr.msra.gmra.mrb[12].mxu1 %vm607_vm2, %v1483_v35 }
 0x8f7   : > { %v1553_v37 = vpop.f32.mrb[12].mxu1 }
 0x8f8   : > { %v1557_v39 = vadd.f32 %v1553_v37, %v1318_v1  ;;  %v1871_v40 = vpop.f32.mrb[13].mxu1 }
 0x8fa   : > { %v1565_v41 = vadd.f32 %v1751_v38, %v1557_v39 }
 0x8fc   : > { %1566 = vst.msk [vmem:[%s417_s21] sm:$0xff] %vm434_vm1, %v1565_v41 }
 0x8fd   : > { %2164 = shalt.err (!%p2161_p5)
}
 0x8fe   : > { %s2165_s26 = scalar_lea.hbm %s2672_s11, 128  ;;  %s2169_s24 = scalar_lea.hbm %s2763_s16, 256 }
 0x8ff   : > { %p2166_p6 = scmp.ne.s32.totalorder %s2672_s11, %s2165_s26  ;;  %p2170_p12 = scmp.lt.u32.totalorder %s2672_s11, %s2763_s16 }
 0x900   : > { %p2171_p11 = scmp.lt.u32.totalorder %s2169_s24, %s2165_s26  ;;  %p2173_p0 = scmp.lt.u32.totalorder %s2165_s26, %s2672_s11 }
 0x901   : > { %p2167_p10 = pnand %p2166_p6, %p2764_p2 }
 0x902   : > { %p2172_p9 = por %p2171_p11, %p2170_p12 }
 0x903   : > { %p2168_p7 = pneg %p2167_p10 }
 0x904   : > { %p2174_p4 = por %p2173_p0, %p2172_p9 }
 0x906   : > { %p2175_p8 = pnand %p2174_p4, %p2168_p7 }
 0x908   : > { %2178 = shalt.err (!%p2175_p8)
}
 0x909   : > { %1900 = dma.vmem_to_hbm [thread:$0]  (%p2764_p2), %s2674_s20, 128, %s2672_s11, %s1568_s13  }
 0x90a PF: > { %s2765_s19 = sld [smem:[#allocation19_spill]]  ;;  %s2766_s23 = sld [smem:[#allocation20_spill]] }
 0x90b   : > { %p2768_p13 = scmp.ge.s32.totalorder %s2245_s10, 2 }
 0x910   : > { %s1594_s14 = sand.u32 1, %s2765_s19   ;;  %p2767_p1 = scmp.ne.s32.totalorder %s2766_s23, 0 }
 0x911   : > { %s1595_s21 = scalar_lea.sflag [#allocation6], %s1594_s14 }
 0x912   : > { %p1920_p3 = pnand %p2768_p13, %p2767_p1 }
 0x914   : > { %2220 = dma.done.wait (!%p1920_p3), %s1595_s21, 128  }
 0x915   : > { %2222 = vsyncadd (!%p1920_p3), %s1595_s21, 4294967168  ;;  %s28_s10 = sadd.s32 1, %s2245_s10   ;;  %s2769_s27 = smov %s2229_s28 }
 0x916   : > { %p25_p5 = scmp.ge.s32.totalorder %s28_s10, 4   ;;  %s2770_s28 = smov %s2233_s29 }
 0x917   : > { %s2771_s29 = smov %s2477_s25  ;;  %s2772_s30 = smov %s2241_s9 }
 0x918   : > { %s2773_s9 = smov %s2775_s18  ;;  %27 = sbr.rel (!%p25_p5) target bundleno = 15 (0xf), region = 126 }
 0x91f   :  { %1600 = vsyncpa [#allocation5], 1 }
 0x920   :  { %1602 = vsyncpa [#allocation5 + $0x1], 1 }
 0x921   :  { %1603 = vsyncpa [#allocation8], 1 }
 0x922   :  { %1605 = vsyncpa [#allocation8 + $0x1], 1 }
 0x923   :  { %1606 = vsyncpa [#allocation11], 1 }
 0x924   :  { %1607 = vsyncpa [#allocation6], 1 }
 0x925   :  { %1609 = vsyncpa [#allocation6 + $0x1], 1 }

</bundles_post_ra>
